<compile_context>
chip_gen: v5e
topology: v5e:2x2
jax: 0.10.0
libtpu: 0.0.40
codegen_flags: <defaults>
</compile_context>

<pallas_src>
import jax
import jax.numpy as jnp
from jax.experimental import pallas as pl
from jax.experimental.pallas import tpu as pltpu


OUT_PAD = 128      # lane-dense padded output width (real logits occupy columns 0..9)
NEG_BIG = -1e30    # bias fill for padded logit columns (fp32-representable)


def q_mlp_kernel(x_ref, w1_ref, b1_ref, w2_ref, b2_ref, w3_ref, b3_ref, o_ref):
    # Fused 3-layer MLP + log-softmax over one batch tile, all resident in VMEM.
    # All matmuls run the MXU with bf16 inputs and fp32 accumulation.
    x = x_ref[...].astype(jnp.bfloat16)                                   # (TB, 784)

    h1 = jnp.dot(x, w1_ref[...], preferred_element_type=jnp.float32) + b1_ref[...]
    h1 = jnp.maximum(h1, 0.0).astype(jnp.bfloat16)                        # (TB, 128)

    h2 = jnp.dot(h1, w2_ref[...], preferred_element_type=jnp.float32) + b2_ref[...]
    h2 = jnp.maximum(h2, 0.0).astype(jnp.bfloat16)                        # (TB, 64)

    # Padded layer 3: columns 10..127 have zero weights and bias -1e30, so their
    # logits are ~-1e30 and contribute ~0 to the softmax denominator.
    logits = jnp.dot(h2, w3_ref[...], preferred_element_type=jnp.float32) + b3_ref[...]
    # (TB, 128), fp32

    # LogSoftmax(dim=1), numerically stable; padding columns never win the max.
    m = jnp.max(logits, axis=1, keepdims=True)
    shifted = logits - m
    lse = jnp.log(jnp.sum(jnp.exp(shifted), axis=1, keepdims=True))
    o_ref[...] = (shifted - lse).astype(o_ref.dtype)


def _round_up(v, m):
    return ((v + m - 1) // m) * m


def q_forward(x, params, *, batch_tile=1024, min_tiles=2, return_padded=False):
    """x: (B, 784) float32/bf16 -> (B, 10) float32 log-probabilities.

    If return_padded=True, returns the (B_pad, OUT_PAD) lane-dense slab instead
    (rows >= B and columns >= 10 are padding) so the caller can fuse the slice
    into its consumer and skip an extra HBM pass.
    """
    w1, b1, w2, b2, w3, b3 = params
    B, D_in = x.shape
    assert D_in == 784

    # Weights in bf16 (cast once, VMEM-resident); biases stay fp32.
    w1b = w1.astype(jnp.bfloat16)
    w2b = w2.astype(jnp.bfloat16)
    w3p = jnp.zeros((w3.shape[0], OUT_PAD), jnp.bfloat16).at[:, :10].set(
        w3.astype(jnp.bfloat16))
    b3p = jnp.full((1, OUT_PAD), NEG_BIG, jnp.float32).at[:, :10].set(
        b3.astype(jnp.float32))
    b1f = b1.astype(jnp.float32)
    b2f = b2.astype(jnp.float32)

    # Balanced tile selection:
    #   * at least `min_tiles` tiles when the batch permits (v7x: 2 TensorCores),
    #   * TB rounded up to a multiple of 8, last tile padded by at most 7 rows.
    n_tiles = max(pl.cdiv(B, batch_tile), min(min_tiles, pl.cdiv(B, 8)))
    TB = _round_up(pl.cdiv(B, n_tiles), 8)
    n_tiles = pl.cdiv(B, TB)
    B_pad = n_tiles * TB
    if B_pad != B:
        x = jnp.pad(x, ((0, B_pad - B), (0, 0)))

    def resident(arr):
        # Whole-array block with a constant index_map -> stays VMEM-resident
        # across grid steps (never re-fetched).
        return pl.BlockSpec(arr.shape, lambda i: (0,) * arr.ndim)

    out = pl.pallas_call(
        q_mlp_kernel,
        out_shape=jax.ShapeDtypeStruct((B_pad, OUT_PAD), jnp.float32),
        grid_spec=pl.GridSpec(
            grid=(n_tiles,),
            in_specs=[
                pl.BlockSpec((TB, 784), lambda i: (i, 0)),   # x tile (only per-step DMA)
                resident(w1b),   # (784, 128) bf16
                resident(b1f),   # (1, 128)   f32
                resident(w2b),   # (128, 64)  bf16
                resident(b2f),   # (1, 64)    f32
                resident(w3p),   # (64, 128)  bf16
                resident(b3p),   # (1, 128)   f32
            ],
            out_specs=pl.BlockSpec((TB, OUT_PAD), lambda i: (i, 0)),
        ),
        compiler_params=pltpu.CompilerParams(
            dimension_semantics=("parallel",),
        ),
    )(x, w1b, b1f, w2b, b2f, w3p, b3p)

    if return_padded:
        return out
    return out[:B, :10]


def init_params(key):
    """Deterministic init mimicking PyTorch nn.Linear default (uniform +/- 1/sqrt(fan_in)).
    Weights are stored as (in, out)."""
    dims = [(784, 128), (128, 64), (64, 10)]
    params = []
    keys = jax.random.split(key, 2 * len(dims))
    for idx, (fan_in, fan_out) in enumerate(dims):
        bound = 1.0 / jnp.sqrt(fan_in)
        w = jax.random.uniform(keys[2 * idx], (fan_in, fan_out), jnp.float32,
                               minval=-bound, maxval=bound)
        b = jax.random.uniform(keys[2 * idx + 1], (1, fan_out), jnp.float32,
                               minval=-bound, maxval=bound)
        params.extend([w, b])
    return tuple(params)


def q_reference(x, params):
    """Pure-JAX fp32 reference for correctness checking."""
    w1, b1, w2, b2, w3, b3 = params
    h1 = jnp.maximum(x @ w1 + b1, 0.0)
    h2 = jnp.maximum(h1 @ w2 + b2, 0.0)
    logits = h2 @ w3 + b3
    return jax.nn.log_softmax(logits, axis=1)


if __name__ == "__main__":
    key = jax.random.PRNGKey(0)
    pkey, xkey = jax.random.split(key)
    params = init_params(pkey)

    B = 64  # small batch; input feature size fixed at 784 by the module
    x = jax.random.normal(xkey, (B, 784), dtype=jnp.float32)
    ref = q_reference(x, params)

    # Tolerances loosened vs. the fp32 reference because the matmuls use bf16
    # MXU inputs (fp32 accumulation); observed error is a few 1e-3.
    ATOL, RTOL = 3e-2, 2e-2

    # Default path: 2 balanced tiles of 32 rows (keeps both v7x TCs busy).
    out = jax.block_until_ready(q_forward(x, params))
    assert out.shape == (B, 10)
    assert jnp.allclose(out, ref, atol=ATOL, rtol=RTOL), "mismatch vs reference"

    # Multi-tile path (grid of 4) to exercise batch tiling + weight residency.
    out2 = jax.block_until_ready(q_forward(x, params, batch_tile=16))
    assert jnp.allclose(out2, ref, atol=ATOL, rtol=RTOL), "mismatch vs reference (tiled)"

    # Odd batch to exercise the balanced-tile rounding + row padding path.
    B3 = 37
    x3 = x[:B3]
    ref3 = q_reference(x3, params)
    out3 = jax.block_until_ready(q_forward(x3, params))
    assert out3.shape == (B3, 10)
    assert jnp.allclose(out3, ref3, atol=ATOL, rtol=RTOL), "mismatch vs reference (odd B)"

    # Padded-slab path: rows >= B and columns >= 10 are padding; real region matches.
    out4 = jax.block_until_ready(q_forward(x, params, return_padded=True))
    assert out4.shape[1] == OUT_PAD and out4.shape[0] >= B
    assert jnp.allclose(out4[:B, :10], ref, atol=ATOL, rtol=RTOL), "mismatch (padded slab)"

    print("KERNEL_OK")
</pallas_src>

<mosaic_0001>
module attributes {stable_mosaic.version = 11 : i64} {
  func.func @q_mlp_kernel(%arg0: i32, %arg1: memref<32x784xf32, #tpu.memory_space<vmem>>, %arg2: memref<784x128xbf16, #tpu.memory_space<vmem>>, %arg3: memref<1x128xf32, #tpu.memory_space<vmem>>, %arg4: memref<128x64xbf16, #tpu.memory_space<vmem>>, %arg5: memref<1x64xf32, #tpu.memory_space<vmem>>, %arg6: memref<64x128xbf16, #tpu.memory_space<vmem>>, %arg7: memref<1x128xf32, #tpu.memory_space<vmem>>, %arg8: memref<32x128xf32, #tpu.memory_space<vmem>>) attributes {dimension_semantics = [#tpu.dimension_semantics<parallel>], iteration_bounds = array<i64: 2>, scalar_prefetch = 0 : i64, scratch_operands = 0 : i64, tpu.core_type = #tpu.core_type<tc>, window_params = [{transform_indices = @transform_0, window_bounds = array<i64: 32, 784>}, {pipeline_mode = #tpu.pipeline_mode<synchronous>, transform_indices = @transform_1, window_bounds = array<i64: 784, 128>}, {pipeline_mode = #tpu.pipeline_mode<synchronous>, transform_indices = @transform_2, window_bounds = array<i64: 1, 128>}, {pipeline_mode = #tpu.pipeline_mode<synchronous>, transform_indices = @transform_3, window_bounds = array<i64: 128, 64>}, {pipeline_mode = #tpu.pipeline_mode<synchronous>, transform_indices = @transform_4, window_bounds = array<i64: 1, 64>}, {pipeline_mode = #tpu.pipeline_mode<synchronous>, transform_indices = @transform_5, window_bounds = array<i64: 64, 128>}, {pipeline_mode = #tpu.pipeline_mode<synchronous>, transform_indices = @transform_6, window_bounds = array<i64: 1, 128>}, {transform_indices = @transform_7, window_bounds = array<i64: 32, 128>}]} {
    %c0 = arith.constant 0 : index
    %c0_0 = arith.constant 0 : index
    %0 = vector.load %arg1[%c0, %c0_0] : memref<32x784xf32, #tpu.memory_space<vmem>>, vector<32x784xf32>
    %1 = arith.truncf %0 : vector<32x784xf32> to vector<32x784xbf16>
    %c0_1 = arith.constant 0 : index
    %c0_2 = arith.constant 0 : index
    %2 = vector.load %arg2[%c0_1, %c0_2] : memref<784x128xbf16, #tpu.memory_space<vmem>>, vector<784x128xbf16>
    %cst = arith.constant dense<0.000000e+00> : vector<32x128xf32>
    %3 = tpu.matmul %1, %2, %cst {dimension_numbers = #tpu.dot_dimension_numbers<[1], [0], [0], [1], [0, 0, 1, 1], [], []>} : vector<32x784xbf16>, vector<784x128xbf16>, vector<32x128xf32> -> vector<32x128xf32>
    %c0_3 = arith.constant 0 : index
    %c0_4 = arith.constant 0 : index
    %4 = vector.load %arg3[%c0_3, %c0_4] : memref<1x128xf32, #tpu.memory_space<vmem>>, vector<1x128xf32>
    %5 = vector.broadcast %4 : vector<1x128xf32> to vector<32x128xf32>
    %6 = arith.addf %3, %5 : vector<32x128xf32>
    %cst_5 = arith.constant 0.000000e+00 : f32
    %7 = vector.broadcast %cst_5 : f32 to vector<32x128xf32>
    %8 = arith.maximumf %6, %7 : vector<32x128xf32>
    %9 = arith.truncf %8 : vector<32x128xf32> to vector<32x128xbf16>
    %c0_6 = arith.constant 0 : index
    %c0_7 = arith.constant 0 : index
    %10 = vector.load %arg4[%c0_6, %c0_7] : memref<128x64xbf16, #tpu.memory_space<vmem>>, vector<128x64xbf16>
    %cst_8 = arith.constant dense<0.000000e+00> : vector<32x64xf32>
    %11 = tpu.matmul %9, %10, %cst_8 {dimension_numbers = #tpu.dot_dimension_numbers<[1], [0], [0], [1], [0, 0, 1, 1], [], []>} : vector<32x128xbf16>, vector<128x64xbf16>, vector<32x64xf32> -> vector<32x64xf32>
    %c0_9 = arith.constant 0 : index
    %c0_10 = arith.constant 0 : index
    %12 = vector.load %arg5[%c0_9, %c0_10] : memref<1x64xf32, #tpu.memory_space<vmem>>, vector<1x64xf32>
    %13 = vector.broadcast %12 : vector<1x64xf32> to vector<32x64xf32>
    %14 = arith.addf %11, %13 : vector<32x64xf32>
    %cst_11 = arith.constant 0.000000e+00 : f32
    %15 = vector.broadcast %cst_11 : f32 to vector<32x64xf32>
    %16 = arith.maximumf %14, %15 : vector<32x64xf32>
    %17 = arith.truncf %16 : vector<32x64xf32> to vector<32x64xbf16>
    %c0_12 = arith.constant 0 : index
    %c0_13 = arith.constant 0 : index
    %18 = vector.load %arg6[%c0_12, %c0_13] : memref<64x128xbf16, #tpu.memory_space<vmem>>, vector<64x128xbf16>
    %cst_14 = arith.constant dense<0.000000e+00> : vector<32x128xf32>
    %19 = tpu.matmul %17, %18, %cst_14 {dimension_numbers = #tpu.dot_dimension_numbers<[1], [0], [0], [1], [0, 0, 1, 1], [], []>} : vector<32x64xbf16>, vector<64x128xbf16>, vector<32x128xf32> -> vector<32x128xf32>
    %c0_15 = arith.constant 0 : index
    %c0_16 = arith.constant 0 : index
    %20 = vector.load %arg7[%c0_15, %c0_16] : memref<1x128xf32, #tpu.memory_space<vmem>>, vector<1x128xf32>
    %21 = vector.broadcast %20 : vector<1x128xf32> to vector<32x128xf32>
    %22 = arith.addf %19, %21 : vector<32x128xf32>
    %cst_17 = arith.constant dense<0xFF800000> : vector<32xf32>
    %23 = vector.multi_reduction <maximumf>, %22, %cst_17 [1] : vector<32x128xf32> to vector<32xf32>
    %24 = vector.shape_cast %23 : vector<32xf32> to vector<32x1xf32>
    %25 = vector.broadcast %24 : vector<32x1xf32> to vector<32x128xf32>
    %26 = arith.subf %22, %25 : vector<32x128xf32>
    %27 = math.exp %26 : vector<32x128xf32>
    %cst_18 = arith.constant dense<0.000000e+00> : vector<32xf32>
    %28 = vector.multi_reduction <add>, %27, %cst_18 [1] : vector<32x128xf32> to vector<32xf32>
    %29 = vector.shape_cast %28 : vector<32xf32> to vector<32x1xf32>
    %30 = math.log %29 : vector<32x1xf32>
    %31 = vector.broadcast %30 : vector<32x1xf32> to vector<32x128xf32>
    %32 = arith.subf %26, %31 : vector<32x128xf32>
    %c0_19 = arith.constant 0 : index
    %c0_20 = arith.constant 0 : index
    %33 = vector.load %arg8[%c0_19, %c0_20] : memref<32x128xf32, #tpu.memory_space<vmem>>, vector<32x128xf32>
    tpu.vector_store %arg8[%c0_19, %c0_20], %32 {strides = array<i32>} : memref<32x128xf32, #tpu.memory_space<vmem>>, vector<32x128xf32>,
    return
  }
  func.func @transform_0(%arg0: i32) -> (i32, i32) {
    %c0_i32 = arith.constant 0 : i32
    %c0_i32_0 = arith.constant 0 : i32
    return %arg0, %c0_i32 : i32, i32
  }
  func.func @transform_1(%arg0: i32) -> (i32, i32) {
    %c0_i32 = arith.constant 0 : i32
    %c0_i32_0 = arith.constant 0 : i32
    %c0_i32_1 = arith.constant 0 : i32
    return %c0_i32, %c0_i32_0 : i32, i32
  }
  func.func @transform_2(%arg0: i32) -> (i32, i32) {
    %c0_i32 = arith.constant 0 : i32
    %c0_i32_0 = arith.constant 0 : i32
    %c0_i32_1 = arith.constant 0 : i32
    return %c0_i32, %c0_i32_0 : i32, i32
  }
  func.func @transform_3(%arg0: i32) -> (i32, i32) {
    %c0_i32 = arith.constant 0 : i32
    %c0_i32_0 = arith.constant 0 : i32
    %c0_i32_1 = arith.constant 0 : i32
    return %c0_i32, %c0_i32_0 : i32, i32
  }
  func.func @transform_4(%arg0: i32) -> (i32, i32) {
    %c0_i32 = arith.constant 0 : i32
    %c0_i32_0 = arith.constant 0 : i32
    %c0_i32_1 = arith.constant 0 : i32
    return %c0_i32, %c0_i32_0 : i32, i32
  }
  func.func @transform_5(%arg0: i32) -> (i32, i32) {
    %c0_i32 = arith.constant 0 : i32
    %c0_i32_0 = arith.constant 0 : i32
    %c0_i32_1 = arith.constant 0 : i32
    return %c0_i32, %c0_i32_0 : i32, i32
  }
  func.func @transform_6(%arg0: i32) -> (i32, i32) {
    %c0_i32 = arith.constant 0 : i32
    %c0_i32_0 = arith.constant 0 : i32
    %c0_i32_1 = arith.constant 0 : i32
    return %c0_i32, %c0_i32_0 : i32, i32
  }
  func.func @transform_7(%arg0: i32) -> (i32, i32) {
    %c0_i32 = arith.constant 0 : i32
    %c0_i32_0 = arith.constant 0 : i32
    return %arg0, %c0_i32 : i32, i32
  }
}

</mosaic_0001>

<bundles_post_ra>
// kernel: tpu_custom_call.1
= control target key start
LH: loop header
LB: loop body
LE: loop exit
PB: predicated region body
PF: predicated region fallthrough
CT: control target
= control target key end

     0   :  { %s2009_s0 = inlined_call_operand.hbm [shape: f32[64,784], index: 0, kind: input, shape index: {}]   ;;  %s2010_s1 = inlined_call_operand.hbm [shape: bf16[784,128], index: 1, kind: input, shape index: {}]   ;;  %s2011_s2 = inlined_call_operand.vmem [shape: f32[1,128], index: 2, kind: input, shape index: {}]   ;;  %s2012_s3 = inlined_call_operand.vmem [shape: bf16[128,64], index: 3, kind: input, shape index: {}]   ;;  %s2013_s4 = inlined_call_operand.vmem [shape: f32[1,64], index: 4, kind: input, shape index: {}]   ;;  %s2014_s5 = inlined_call_operand.vmem [shape: bf16[64,128], index: 5, kind: input, shape index: {}]   ;;  %s2015_s6 = inlined_call_operand.vmem [shape: f32[1,128], index: 6, kind: input, shape index: {}]   ;;  %s2016_s7 = inlined_call_operand.hbm [shape: f32[64,128], index: 7, kind: output, shape index: {}]  }
   0x1   :  { %2018 = sst [smem:[#allocation13_spill]] %s2010_s1 }
   0x2   :  { %12 = vsyncpa [#allocation3], 0 }
   0x3   :  { %14 = vsyncpa [#allocation3 + $0x1], 0 }
   0x4   :  { %15 = vsyncpa [#allocation6], 0 }
   0x5   :  { %16 = vsyncpa [#allocation4], 0 }
   0x6   :  { %18 = vsyncpa [#allocation4 + $0x1], 0  ;;  %s1795_s24 = smov 0   ;;  %s1797_s25 = smov 0  }
   0x7   :  { %s1799_s26 = smov 0   ;;  %s1801_s27 = smov 0  }
   0x8 LB: > { %2019 = sst [smem:[#allocation11_spill]] %s1742_s26  ;;  %s1816_s28 = sadd.s32 4294967295, %s1746_s27   ;;  %s1746_s27 = sphi %s1801_s27, %s2032_s27   ;;  %s1742_s26 = sphi %s1799_s26, %s2029_s26   ;;  %s1738_s25 = sphi %s1797_s25, %s2031_s25   ;;  %s1734_s24 = sphi %s1795_s24, %s2030_s24  }
   0x9   : > { %s1202_s29 = sadd.s32 4294967294, %s1746_s27   ;;  %p44_p0 = scmp.ne.s32.totalorder %s1738_s25, %s1734_s24 }
   0xa   : > { %p45_p1 = scmp.eq.s32.totalorder %s1816_s28, 0  ;;  %p194_p2 = scmp.eq.s32.totalorder %s1816_s28, 1 }
   0xb   : > { %p200_p3 = scmp.eq.s32.totalorder %s1202_s29, 1  ;;  %p1203_p5 = scmp.ge.s32.totalorder %s1746_s27, 1 }
   0xc   : > { %p1825_p4 = por %p45_p1, %p44_p0  ;;  %p207_p7 = scmp.lt.s32.totalorder %s1746_s27, 3 }
   0xd   : > { %p1830_p6 = por %p200_p3, %p44_p0  ;;  %s2022_s1 = sld [smem:[#allocation13_spill]] }
   0xe   : > { %p1838_p8 = pnand %p1203_p5, %p207_p7  ;;  %s1748_s13 = smov [#allocation5]  }
   0xf   : > { %s220_s14 = sshll.u32 %s1748_s13, 4  ;;  %s1848_s15 = sadd.s32 1, %s1746_s27   ;;  %s221_s14 = int_to_ptr.vmem [resolvable:$true] %s220_s14 }
  0x10   : > { %p1542_p9 = pneg %p1838_p8  ;;  %s1749_s16 = smov 64  }
  0x11   : > { %s1750_s17 = smov 4   ;;  %s28_s18 = ssub.s32 %s1746_s27, %s1848_s15 }
  0x12   : > { %p1543_p10 = pnand %p1542_p9, %p45_p1  ;;  %s31_s19 = sadd.s32 1, %s1742_s26 }
  0x13   : > { %s218_s11 = sshll.u32 %s2022_s1, 4  ;;  %p29_p12 = scmp.eq.s32.totalorder %s28_s18, 0  ;;  %s219_s11 = int_to_ptr.hbm [resolvable:$true] %s218_s11 }
  0x14   : > { %1545 = dma.hbm_to_vmem [thread:$0]  (!%p1543_p10), %s219_s11, 6272, %s221_s14, [#allocation6], %s1749_s16, %s1749_s16, %s1750_s17  }
  0x15   : > { %p38_p13 = scmp.ne.s32.totalorder %s1742_s26, %s1738_s25  ;;  %p39_p0 = scmp.eq.s32.totalorder %s1746_s27, 0 }
  0x16   : > { %p1555_p3 = scmp.lt.s32.totalorder %s1746_s27, 2  ;;  %s249_s22 = sand.u32 1, %s1742_s26  }
  0x17   : > { %s1858_s20 = scalar_select %p29_p12, %s1742_s26, %s31_s19  }
  0x18   : > { %p40_p5 = por %p39_p0, %p38_p13  ;;  %p1862_p7 = por %p194_p2, %p38_p13 }
  0x19   : > { %2024 = sst [smem:[#allocation12_spill]] %s1858_s20  ;;  %s1532_s23 = smul.u32 224, %s1746_s27 }
  0x1a   : > { %s1531_s29 = smul.u32 224, %s249_s22  ;;  %p1871_p9 = pnand %p1555_p3, %p40_p5 }
  0x1b   : > { %s259_s11 = scalar_lea.hbm %s2009_s0, %s1532_s23  ;;  %s250_s18 = scalar_lea.sflag [#allocation3], %s249_s22 }
  0x1c   : > { %s260_s14 = sshll.u32 %s259_s11, 4  ;;  %s253_s16 = scalar_lea.vmem [#allocation2], %s1531_s29  ;;  %s261_s14 = int_to_ptr.hbm [resolvable:$true] %s260_s14 }
  0x1d   : > { %s262_s17 = sshll.u32 %s253_s16, 4  ;;  %s1646_s19 = sshra.s32 %s261_s14, 4  ;;  %s263_s17 = int_to_ptr.vmem [resolvable:$true] %s262_s17  ;;  %s1647_s19 = int_to_ptr.hbm [resolvable:$true] %s1646_s19 }
  0x1e   : > { %s1648_s1 = scalar_lea.hbm %s1647_s19, 224  ;;  %p1650_p10 = pneg %p1871_p9 }
  0x1f   : > { %p1649_p2 = scmp.ne.s32.totalorder %s1647_s19, %s1648_s1  ;;  %s1653_s10 = scalar_lea.hbm %s2009_s0, 448 }
  0x20   : > { %p1654_p0 = scmp.lt.s32.totalorder %s1647_s19, %s2009_s0  ;;  %p1655_p3 = scmp.lt.s32.totalorder %s1653_s10, %s1648_s1 }
  0x21   : > { %p1651_p12 = pnand %p1650_p10, %p1649_p2 }
  0x22   : > { %p1656_p5 = por %p1655_p3, %p1654_p0 }
  0x23   : > { %p1652_p13 = pneg %p1651_p12 }
  0x25   : > { %p1657_p11 = pnand %p1656_p5, %p1652_p13 }
  0x27   : > { %1660 = shalt.err (!%p1657_p11)
}
  0x28   : > { %s1751_s22 = smov 896   ;;  %s1752_s29 = smov 56  }
  0x29   : > { %1549 = dma.hbm_to_vmem [thread:$0]  (!%p1871_p9), %s261_s14, 3584, %s263_s17, %s250_s18, %s1751_s22, %s1751_s22, %s1752_s29  }
  0x2a   : > { %274 = sbr.rel (%p1838_p8) target bundleno = 818 (0x332), region = 48  ;;  %s1888_s11 = sand.u32 (!%p1838_p8), 1, %s1738_s25  }
  0x2b   : > { %s1533_s26 = smul.u32 (!%p1838_p8), 224, %s1888_s11  ;;  %s277_s20 = scalar_lea.sflag (!%p1838_p8), [#allocation3], %s1888_s11 }
  0x2d   : > { %s1892_s1 = scalar_lea.vmem (!%p1838_p8), [#allocation2], %s1533_s26 }
  0x2f   : > { %1721 = dma.done.wait (%p1825_p4), %s277_s20, 3584  }
  0x30   : > { %1723 = vsyncadd (%p1825_p4), %s277_s20, 4294963712 }
  0x31   : > { %1725 = dma.done.wait (%p45_p1), [#allocation6], 6272  }
  0x32   : > { %1727 = vsyncadd (%p45_p1), [#allocation6], 4294961024  ;;  %v1472_v0 = vld [vmem:[#allocation5 + $0x38] sm:$0xff]  ;;  %v1471_v4 = vld [vmem:[#allocation5 + $0x30] sm:$0xff]  ;;  %vm758_vm0 = vcmask 130048   ;;  %vm1033_vm1 = vcmask 523264  }
  0x33   : > { %v1480_v1 = vld [vmem:[#allocation5 + $0x78] sm:$0xff]  ;;  %765 = vmatpush.bf16.msra.mxu0 %v1472_v0  ;;  %v1479_v5 = vld [vmem:[#allocation5 + $0x70] sm:$0xff]  ;;  %v1470_v8 = vld [vmem:[#allocation5 + $0x28] sm:$0xff]  ;;  %s1211_s20 = sshll.u32 %s1888_s11, 5  ;;  %s1526_s30 = sshll.u32 %s1816_s28, 5 }
  0x34   : > { %v1488_v2 = vld [vmem:[#allocation5 + $0xb8] sm:$0xff]  ;;  %784 = vmatpush.bf16.msra.mxu1 %v1480_v1  ;;  %v1487_v6 = vld [vmem:[#allocation5 + $0xb0] sm:$0xff]  ;;  %v1478_v9 = vld [vmem:[#allocation5 + $0x68] sm:$0xff]  ;;  %s1115_s14 = scalar_lea.hbm %s2016_s7, %s1526_s30  ;;  %s1104_s18 = scalar_lea.sflag [#allocation4], %s1888_s11 }
  0x35   : > { %v1496_v3 = vld [vmem:[#allocation5 + $0xf8] sm:$0xff]  ;;  %803 = vmatpush.bf16.msra.mxu2 %v1488_v2  ;;  %v1495_v7 = vld [vmem:[#allocation5 + $0xf0] sm:$0xff]  ;;  %v1486_v10 = vld [vmem:[#allocation5 + $0xa8] sm:$0xff]  ;;  %s1118_s17 = sshll.u32 %s1115_s14, 4  ;;  %s1696_s10 = scalar_lea.hbm %s2016_s7, 64  ;;  %s1119_s17 = int_to_ptr.hbm [resolvable:$true] %s1118_s17 }
  0x36   : > { %822 = vmatpush.bf16.msra.mxu3 %v1496_v3  ;;  %v1494_v11 = vld [vmem:[#allocation5 + $0xe8] sm:$0xff]  ;;  %v1469_v12 = vld [vmem:[#allocation5 + $0x20] sm:$0xff]  ;;  %v1468_v16 = vld [vmem:[#allocation5 + $0x18] sm:$0xff]  ;;  %s1690_s19 = sshra.s32 %s1119_s17, 4  ;;  %s1691_s19 = int_to_ptr.hbm [resolvable:$true] %s1690_s19 }
  0x37   : > { %766 = vmatpush.bf16.msra.mxu0 %v1471_v4  ;;  %v1477_v13 = vld [vmem:[#allocation5 + $0x60] sm:$0xff]  ;;  %v1476_v17 = vld [vmem:[#allocation5 + $0x58] sm:$0xff]  ;;  %v1467_v20 = vld [vmem:[#allocation5 + $0x10] sm:$0xff]  ;;  %s1692_s28 = scalar_lea.hbm %s1691_s19, 32  ;;  %p1697_p11 = scmp.lt.s32.totalorder %s1691_s19, %s2016_s7 }
  0x38   : > { %785 = vmatpush.bf16.msra.mxu1 %v1479_v5  ;;  %v1485_v14 = vld [vmem:[#allocation5 + $0xa0] sm:$0xff]  ;;  %v1484_v18 = vld [vmem:[#allocation5 + $0x98] sm:$0xff]  ;;  %v1475_v21 = vld [vmem:[#allocation5 + $0x50] sm:$0xff]  ;;  %p1693_p1 = scmp.ne.s32.totalorder %s1691_s19, %s1692_s28  ;;  %p1698_p9 = scmp.lt.s32.totalorder %s1696_s10, %s1692_s28 }
  0x39   : > { %804 = vmatpush.bf16.msra.mxu2 %v1487_v6  ;;  %v1493_v15 = vld [vmem:[#allocation5 + $0xe0] sm:$0xff]  ;;  %v1492_v19 = vld [vmem:[#allocation5 + $0xd8] sm:$0xff]  ;;  %v1483_v22 = vld [vmem:[#allocation5 + $0x90] sm:$0xff] }
  0x3a   : > { %823 = vmatpush.bf16.msra.mxu3 %v1495_v7  ;;  %v1491_v23 = vld [vmem:[#allocation5 + $0xd0] sm:$0xff]  ;;  %v1466_v24 = vld [vmem:[#allocation5 + $0x8] sm:$0xff]  ;;  %v1465_v28 = vld [vmem:[#allocation5] sm:$0xff]  ;;  %p1694_p4 = pnand %p1693_p1, %p1862_p7  ;;  %p1699_p2 = por %p1698_p9, %p1697_p11 }
  0x3b   : > { %767 = vmatpush.bf16.msra.mxu0 %v1470_v8  ;;  %v1474_v25 = vld [vmem:[#allocation5 + $0x48] sm:$0xff]  ;;  %v1473_v29 = vld [vmem:[#allocation5 + $0x40] sm:$0xff]  ;;  %v327_v33 = vld [vmem:[%s1892_s1 + $0x38] sm:$0xff] }
  0x3c   : > { %786 = vmatpush.bf16.msra.mxu1 %v1478_v9  ;;  %v1482_v26 = vld [vmem:[#allocation5 + $0x88] sm:$0xff]  ;;  %v1481_v30 = vld [vmem:[#allocation5 + $0x80] sm:$0xff]  ;;  %v322_v36 = vld [vmem:[%s1892_s1 + $0x10] sm:$0xff]  ;;  %p1695_p8 = pneg %p1694_p4 }
  0x3d   : > { %805 = vmatpush.bf16.msra.mxu2 %v1486_v10  ;;  %v1490_v27 = vld [vmem:[#allocation5 + $0xc8] sm:$0xff]  ;;  %v1489_v31 = vld [vmem:[#allocation5 + $0xc0] sm:$0xff]  ;;  %v1504_v39 = vld [vmem:[#allocation5 + $0x138] sm:$0xff] }
  0x3e   : > { %824 = vmatpush.bf16.msra.mxu3 %v1494_v11  ;;  %v320_v32 = vld [vmem:[%s1892_s1] sm:$0xff]  ;;  %v321_v34 = vld [vmem:[%s1892_s1 + $0x8] sm:$0xff]  ;;  %v323_v40 = vld [vmem:[%s1892_s1 + $0x18] sm:$0xff]  ;;  %p1700_p10 = pnand %p1699_p2, %p1695_p8 }
  0x3f   : > { %768 = vmatpush.bf16.msra.mxu0 %v1469_v12  ;;  %v328_v35 = vld [vmem:[%s1892_s1 + $0x40] sm:$0xff]  ;;  %v329_v37 = vld [vmem:[%s1892_s1 + $0x48] sm:$0xff]  ;;  %v330_v41 = vld [vmem:[%s1892_s1 + $0x50] sm:$0xff]  ;;  %v348_v42 = vpack.c.bf16 %v327_v33, %v320_v32 }
  0x40   : > { %787 = vmatpush.bf16.msra.mxu1 %v1477_v13  ;;  %v1513_v38 = vld [vmem:[#allocation5 + $0x180] sm:$0xff]  ;;  %v349_v43 = vpack.c.bf16 %v328_v35, %v321_v34  ;;  %v350_v44 = vpack.c.bf16 %v329_v37, %v322_v36  ;;  %v1512_v45 = vld [vmem:[#allocation5 + $0x178] sm:$0xff]  ;;  %v351_v46 = vpack.c.bf16 %v330_v41, %v323_v40  ;;  %v1503_v47 = vld [vmem:[#allocation5 + $0x130] sm:$0xff] }
  0x41   : > { %806 = vmatpush.bf16.msra.mxu2 %v1485_v14  ;;  %v1511_v48 = vld [vmem:[#allocation5 + $0x170] sm:$0xff]  ;;  %v1502_v49 = vld [vmem:[#allocation5 + $0x128] sm:$0xff]  ;;  %v1501_v51 = vld [vmem:[#allocation5 + $0x120] sm:$0xff] }
  0x42   : > { %825 = vmatpush.bf16.msra.mxu3 %v1493_v15  ;;  %v1510_v50 = vld [vmem:[#allocation5 + $0x168] sm:$0xff]  ;;  %v1509_v52 = vld [vmem:[#allocation5 + $0x160] sm:$0xff]  ;;  %v334_v53 = vld [vmem:[%s1892_s1 + $0x70] sm:$0xff] }
  0x43   : > { %769 = vmatpush.bf16.msra.mxu0 %v1468_v16  ;;  %v341_v54 = vld [vmem:[%s1892_s1 + $0xa8] sm:$0xff]  ;;  %v335_v55 = vld [vmem:[%s1892_s1 + $0x78] sm:$0xff]  ;;  %v342_v56 = vld [vmem:[%s1892_s1 + $0xb0] sm:$0xff] }
  0x44   : > { %788 = vmatpush.bf16.msra.mxu1 %v1476_v17  ;;  %v336_v57 = vld [vmem:[%s1892_s1 + $0x80] sm:$0xff]  ;;  %v343_v58 = vld [vmem:[%s1892_s1 + $0xb8] sm:$0xff]  ;;  %v337_v60 = vld [vmem:[%s1892_s1 + $0x88] sm:$0xff]  ;;  %v355_v62 = vpack.c.bf16 %v341_v54, %v334_v53  ;;  %v356_v63 = vpack.c.bf16 %v342_v56, %v335_v55 }
  0x45   : > { %807 = vmatpush.bf16.msra.mxu2 %v1484_v18  ;;  %v1500_v59 = vld [vmem:[#allocation5 + $0x118] sm:$0xff]  ;;  %v344_v61 = vld [vmem:[%s1892_s1 + $0xc0] sm:$0xff]  ;;  %v357_v0 = vpack.c.bf16 %v343_v58, %v336_v57  ;;  %v1499_v3 = vld [vmem:[#allocation5 + $0x110] sm:$0xff] }
  0x46   : > { %826 = vmatpush.bf16.msra.mxu3 %v1492_v19  ;;  %v1508_v1 = vld [vmem:[#allocation5 + $0x158] sm:$0xff]  ;;  %v358_v2 = vpack.c.bf16 %v344_v61, %v337_v60  ;;  %v1507_v4 = vld [vmem:[#allocation5 + $0x150] sm:$0xff]  ;;  %v1498_v5 = vld [vmem:[#allocation5 + $0x108] sm:$0xff] }
  0x47   : > { %770 = vmatpush.bf16.msra.mxu0 %v1467_v20  ;;  %v1506_v6 = vld [vmem:[#allocation5 + $0x148] sm:$0xff]  ;;  %v1497_v7 = vld [vmem:[#allocation5 + $0x100] sm:$0xff]  ;;  %v331_v10 = vld [vmem:[%s1892_s1 + $0x58] sm:$0xff] }
  0x48   : > { %789 = vmatpush.bf16.msra.mxu1 %v1475_v21  ;;  %v1505_v8 = vld [vmem:[#allocation5 + $0x140] sm:$0xff]  ;;  %v325_v11 = vld [vmem:[%s1892_s1 + $0x28] sm:$0xff]  ;;  %v326_v13 = vld [vmem:[%s1892_s1 + $0x30] sm:$0xff] }
  0x49   : > { %808 = vmatpush.bf16.msra.mxu2 %v1483_v22  ;;  %v324_v9 = vld [vmem:[%s1892_s1 + $0x20] sm:$0xff]  ;;  %v333_v14 = vld [vmem:[%s1892_s1 + $0x68] sm:$0xff]  ;;  %v338_v18 = vld [vmem:[%s1892_s1 + $0x90] sm:$0xff] }
  0x4a   : > { %827 = vmatpush.bf16.msra.mxu3 %v1491_v23  ;;  %v332_v12 = vld [vmem:[%s1892_s1 + $0x60] sm:$0xff]  ;;  %v352_v15 = vpack.c.bf16 %v331_v10, %v324_v9  ;;  %v354_v17 = vpack.c.bf16 %v333_v14, %v326_v13  ;;  %v345_v19 = vld [vmem:[%s1892_s1 + $0xc8] sm:$0xff]  ;;  %v339_v20 = vld [vmem:[%s1892_s1 + $0x98] sm:$0xff] }
  0x4b   : > { %771 = vmatpush.bf16.msra.mxu0 %v1466_v24  ;;  %v353_v16 = vpack.c.bf16 %v332_v12, %v325_v11  ;;  %v346_v21 = vld [vmem:[%s1892_s1 + $0xd0] sm:$0xff]  ;;  %v340_v22 = vld [vmem:[%s1892_s1 + $0xa0] sm:$0xff]  ;;  %v347_v23 = vld [vmem:[%s1892_s1 + $0xd8] sm:$0xff]  ;;  %v359_v24 = vpack.c.bf16 %v345_v19, %v338_v18  ;;  %s316_s1 = scalar_lea.vmem [#allocation7], %s1211_s20 }
  0x4c   : > { %790 = vmatpush.bf16.msra.mxu1 %v1474_v25  ;;  %v360_v25 = vpack.c.bf16 %v346_v21, %v339_v20  ;;  %v1518_v32 = vld [vmem:[%s2012_s3 + $0x20] sm:$0xff]  ;;  %v1517_v33 = vld [vmem:[%s2012_s3 + $0x18] sm:$0xff]  ;;  %v1516_v37 = vld [vmem:[%s2012_s3 + $0x10] sm:$0xff]  ;;  %s1116_s16 = sshll.u32 %s316_s1, 4  ;;  %s1117_s16 = int_to_ptr.vmem [resolvable:$true] %s1116_s16 }
  0x4d   : > { %809 = vmatpush.bf16.msra.mxu2 %v1482_v26  ;;  %v361_v26 = vpack.c.bf16 %v347_v23, %v340_v22 }
  0x4e   : > { %828 = vmatpush.bf16.msra.mxu3 %v1490_v27  ;;  %v1521_v27 = vld [vmem:[%s2012_s3 + $0x38] sm:$0xff] }
  0x4f   : > { %772 = vmatpush.bf16.msra.mxu0 %v1465_v28  ;;  %v1520_v28 = vld [vmem:[%s2012_s3 + $0x30] sm:$0xff] }
  0x50   : > { %791 = vmatpush.bf16.msra.mxu1 %v1473_v29  ;;  %v1519_v29 = vld [vmem:[%s2012_s3 + $0x28] sm:$0xff] }
  0x51   : > { %810 = vmatpush.bf16.msra.mxu2 %v1481_v30 }
  0x52   : > { %829 = vmatpush.bf16.msra.mxu3 %v1489_v31  ;;  %773 = vmatmul.bf16.vlgmr.msra.gmra.mxu0 %v348_v42  ;;  %v1514_v42 = vld [vmem:[%s2012_s3] sm:$0xff] }
  0x53   : > { %841 = vmatpush.bf16.msrb.mxu0 %v1504_v39  ;;  %792 = vmatmul.bf16.vlgmr.msra.gmra.mxu1 %v349_v43  ;;  %v1597_v43 = vld [vmem:[%s2011_s2] ss:$0 sm:$0xff] }
  0x54   : > { %811 = vmatmul.bf16.vlgmr.msra.gmra.mxu2 %v350_v44  ;;  %860 = vmatpush.bf16.msrb.mxu1 %v1512_v45 }
  0x55   : > { %886 = vmatpush.bf16.msrb.mxu2 %v1513_v38  ;;  %830 = vmatmul.bf16.vlgmr.msra.gmra.mxu3 %v351_v46  ;;  %v1515_v38 = vld [vmem:[%s2012_s3 + $0x8] sm:$0xff] }
  0x56   : > { %972 = vmatpush.bf16.msrb.mxu3 %v1521_v27 }
  0x57   : > { %842 = vmatpush.bf16.msrb.mxu0 %v1503_v47 }
  0x58   : > { %861 = vmatpush.bf16.msrb.mxu1 %v1511_v48 }
  0x5a   : > { %973 = vmatpush.bf16.msrb.mxu3 %v1520_v28 }
  0x5b   : > { %843 = vmatpush.bf16.msrb.mxu0 %v1502_v49 }
  0x5c   : > { %862 = vmatpush.bf16.msrb.mxu1 %v1510_v50 }
  0x5e   : > { %974 = vmatpush.bf16.msrb.mxu3 %v1519_v29 }
  0x5f   : > { %844 = vmatpush.bf16.msrb.mxu0 %v1501_v51 }
  0x60   : > { %863 = vmatpush.bf16.msrb.mxu1 %v1509_v52 }
  0x62   : > { %778 = vmatmul.bf16.gmra.mxu0 %v355_v62  ;;  %975 = vmatpush.bf16.msrb.mxu3 %v1518_v32 }
  0x63   : > { %845 = vmatpush.bf16.msrb.mxu0 %v1500_v59  ;;  %797 = vmatmul.bf16.gmra.mxu1 %v356_v63  ;;  %v1525_v59 = vld [vmem:[%s2014_s5 + $0x18] sm:$0xff] }
  0x64   : > { %816 = vmatmul.bf16.gmra.mxu2 %v357_v0  ;;  %864 = vmatpush.bf16.msrb.mxu1 %v1508_v1 }
  0x65   : > { %835 = vmatmul.bf16.gmra.mxu3 %v358_v2 }
  0x66   : > { %976 = vmatpush.bf16.msrb.mxu3 %v1517_v33 }
  0x67   : > { %846 = vmatpush.bf16.msrb.mxu0 %v1499_v3 }
  0x68   : > { %865 = vmatpush.bf16.msrb.mxu1 %v1507_v4 }
  0x6a   : > { %977 = vmatpush.bf16.msrb.mxu3 %v1516_v37  ;;  %v1522_v37 = vld [vmem:[%s2014_s5] sm:$0xff] }
  0x6b   : > { %847 = vmatpush.bf16.msrb.mxu0 %v1498_v5 }
  0x6c   : > { %866 = vmatpush.bf16.msrb.mxu1 %v1506_v6 }
  0x6e   : > { %978 = vmatpush.bf16.msrb.mxu3 %v1515_v38 }
  0x6f   : > { %848 = vmatpush.bf16.msrb.mxu0 %v1497_v7 }
  0x70   : > { %867 = vmatpush.bf16.msrb.mxu1 %v1505_v8 }
  0x72   : > { %849 = vmatmul.bf16.vlgmr.msrb.gmra.mxu0 %v352_v15  ;;  %979 = vmatpush.bf16.msrb.mxu3 %v1514_v42 }
  0x73   : > { %868 = vmatmul.bf16.vlgmr.msrb.gmra.mxu1 %v353_v16  ;;  %1044 = vmatpush.bf16.msra.mxu0 %v1525_v59 }
  0x74   : > { %1408 = vmatmul.msk.bf16.vlgmr.msrb.gmra.mxu2 %vm758_vm0, %v354_v17  ;;  %1527 = vmatpush.bf16.msra.mxu1 %v1525_v59 }
  0x82   : > { %854 = vmatmul.bf16.gmra.mxu0 %v359_v24 }
  0x83   : > { %873 = vmatmul.bf16.gmra.mxu1 %v360_v25 }
  0x84   : > { %1409 = vmatmul.msk.bf16.gmra.mxu2 %vm758_vm0, %v361_v26 }
  0xcf   : > { %v774_v30 = vpop.f32.mrf.mxu0 }
  0xd0   : > { %v793_v31 = vpop.f32.mrf.mxu1  ;;  %v775_v48 = vadd.f32 %v1597_v43, %v774_v30 }
  0xd2   : > { %v794_v49 = vadd.f32 %v793_v31, %v775_v48 }
  0xd7   : > { %v812_v34 = vpop.f32.mrf.mxu2  ;;  %v776_v35 = vpop.f32.mrf.mxu0 }
  0xd8   : > { %v795_v36 = vpop.f32.mrf.mxu1  ;;  %v831_v44 = vpop.f32.mrf.mxu3  ;;  %v777_v50 = vadd.f32 %v1597_v43, %v776_v35  ;;  %v813_v55 = vadd.f32 %v812_v34, %v794_v49  ;;  %v1524_v35 = vld [vmem:[%s2014_s5 + $0x10] sm:$0xff] }
  0xd9   : > { %1045 = vmatpush.bf16.msra.mxu0 %v1524_v35  ;;  %1528 = vmatpush.bf16.msra.mxu1 %v1524_v35 }
  0xda   : > { %v796_v56 = vadd.f32 %v795_v36, %v777_v50  ;;  %v832_v58 = vadd.f32 %v831_v44, %v813_v55  ;;  %v1523_v36 = vld [vmem:[%s2014_s5 + $0x8] sm:$0xff] }
  0xdd   : > { %1046 = vmatpush.bf16.msra.mxu0 %v1523_v36  ;;  %1529 = vmatpush.bf16.msra.mxu1 %v1523_v36 }
  0xdf   : > { %v814_v39 = vpop.f32.mrf.mxu2  ;;  %v779_v40 = vpop.f32.mrf.mxu0 }
  0xe0   : > { %v798_v41 = vpop.f32.mrf.mxu1  ;;  %v833_v54 = vpop.f32.mrf.mxu3  ;;  %v815_v57 = vadd.f32 %v814_v39, %v796_v56  ;;  %v780_v1 = vadd.f32 %v1597_v43, %v779_v40  ;;  %v1598_v39 = vld [vmem:[%s2013_s4] ss:$0 sm:$0xff] }
  0xe1   : > { %1047 = vmatpush.bf16.msra.mxu0 %v1522_v37  ;;  %1530 = vmatpush.bf16.msra.mxu1 %v1522_v37 }
  0xe2   : > { %v834_v61 = vadd.f32 %v833_v54, %v815_v57  ;;  %v799_v5 = vadd.f32 %v798_v41, %v780_v1 }
  0xe7   : > { %v817_v45 = vpop.f32.mrf.mxu2  ;;  %v781_v46 = vpop.f32.mrf.mxu0 }
  0xe8   : > { %v800_v47 = vpop.f32.mrf.mxu1  ;;  %v836_v3 = vpop.f32.mrf.mxu3  ;;  %v782_v6 = vadd.f32 %v1597_v43, %v781_v46  ;;  %v818_v12 = vadd.f32 %v817_v45, %v799_v5 }
  0xea   : > { %v801_v13 = vadd.f32 %v800_v47, %v782_v6  ;;  %v837_v20 = vadd.f32 %v836_v3, %v818_v12 }
  0xef   : > { %v819_v51 = vpop.f32.mrf.mxu2  ;;  %v850_v52 = vpop.f32.mrf.mxu0 }
  0xf0   : > { %v869_v53 = vpop.f32.mrf.mxu1  ;;  %v851_v62 = vadd.f32 %v850_v52, %v832_v58  ;;  %v820_v17 = vadd.f32 %v819_v51, %v801_v13  ;;  %v838_v19 = vpop.f32.mrf.mxu3 }
  0xf2   : > { %v870_v4 = vadd.f32 %v869_v53, %v851_v62  ;;  %v839_v22 = vadd.f32 %v838_v19, %v820_v17  ;;  %v1599_v53 = vld [vmem:[%s2015_s6] ss:$0 sm:$0xff] }
  0xf7   : > { %v888_v60 = vpop.f32.mrf.mxu2  ;;  %v852_v63 = vpop.f32.mrf.mxu0 }
  0xf8   : > { %v871_v0 = vpop.f32.mrf.mxu1  ;;  %v853_v2 = vadd.f32 %v852_v63, %v834_v61  ;;  %v889_v7 = vadd.f32 %v888_v60, %v870_v4 }
  0xfa   : > { %v872_v8 = vadd.f32 %v871_v0, %v853_v2  ;;  %v898_v14 = vmax.f32 %v889_v7, 0.0 }
  0xff   : > { %v890_v9 = vpop.f32.mrf.mxu2  ;;  %v855_v11 = vpop.f32.mrf.mxu0 }
 0x100   : > { %v891_v10 = vadd.f32 %v890_v9, %v872_v8  ;;  %v874_v16 = vpop.f32.mrf.mxu1  ;;  %v856_v23 = vadd.f32 %v855_v11, %v837_v20 }
 0x102   : > { %v899_v15 = vmax.f32 %v891_v10, 0.0  ;;  %v875_v26 = vadd.f32 %v874_v16, %v856_v23 }
 0x104   : > { %v902_v18 = vpack.c.bf16 %v899_v15, %v898_v14 }
 0x106   : > { %980 = vmatmul.bf16.vlgmr.msrb.gmra.mxu3 %v902_v18 }
 0x107   : > { %v893_v21 = vpop.f32.mrf.mxu2  ;;  %v857_v24 = vpop.f32.mrf.mxu0 }
 0x108   : > { %v858_v25 = vadd.f32 %v857_v24, %v839_v22  ;;  %v876_v27 = vpop.f32.mrf.mxu1  ;;  %v894_v28 = vadd.f32 %v893_v21, %v875_v26 }
 0x10a   : > { %v877_v29 = vadd.f32 %v876_v27, %v858_v25  ;;  %v900_v32 = vmax.f32 %v894_v28, 0.0 }
 0x10f   : > { %v895_v30 = vpop.f32.mrf.mxu2 }
 0x110   : > { %v896_v31 = vadd.f32 %v895_v30, %v877_v29 }
 0x112   : > { %v901_v33 = vmax.f32 %v896_v31, 0.0 }
 0x114   : > { %v903_v34 = vpack.c.bf16 %v901_v33, %v900_v32 }
 0x116   : > { %985 = vmatmul.bf16.gmra.mxu3 %v903_v34 }
 0x189   : > { %v981_v38 = vpop.f32.mrf.mxu3 }
 0x18a   : > { %v982_v40 = vadd.f32 %v1598_v39, %v981_v38 }
 0x18c   : > { %v991_v43 = vmax.f32 %v982_v40, 0.0 }
 0x191   : > { %v983_v41 = vpop.f32.mrf.mxu3 }
 0x192   : > { %v984_v42 = vadd.f32 %v1598_v39, %v983_v41 }
 0x194   : > { %v992_v44 = vmax.f32 %v984_v42, 0.0 }
 0x196   : > { %v995_v45 = vpack.c.bf16 %v992_v44, %v991_v43 }
 0x198   : > { %1458 = vmatmul.msk.bf16.vlgmr.msra.gmra.mxu0 %vm1033_vm1, %v995_v45 }
 0x199   : > { %v986_v46 = vpop.f32.mrf.mxu3 }
 0x19a   : > { %v987_v47 = vadd.f32 %v1598_v39, %v986_v46 }
 0x19c   : > { %v993_v50 = vmax.f32 %v987_v47, 0.0 }
 0x1a1   : > { %v988_v48 = vpop.f32.mrf.mxu3 }
 0x1a2   : > { %v989_v49 = vadd.f32 %v1598_v39, %v988_v48 }
 0x1a4   : > { %v994_v51 = vmax.f32 %v989_v49, 0.0 }
 0x1a6   : > { %v996_v52 = vpack.c.bf16 %v994_v51, %v993_v50 }
 0x1a8   : > { %1459 = vmatmul.msk.bf16.vlgmr.msra.gmra.mxu1 %vm1033_vm1, %v996_v52 }
 0x215   : > { %v1049_v54 = vpop.f32.mrf.mxu0 }
 0x216   : > { %v1050_v55 = vadd.f32 %v1599_v53, %v1049_v54 }
 0x218   : > { %1059 = vmax.xlane.f32.xlu0 %v1050_v55 }
 0x21d   : > { %v1051_v56 = vpop.f32.mrf.mxu0 }
 0x21e   : > { %v1052_v57 = vadd.f32 %v1599_v53, %v1051_v56 }
 0x220   : > { %1061 = vmax.xlane.f32.xlu0 %v1052_v57 }
 0x225   : > { %v1054_v58 = vpop.f32.mrf.mxu1 }
 0x226   : > { %v1055_v59 = vadd.f32 %v1599_v53, %v1054_v58 }
 0x228   : > { %1063 = vmax.xlane.f32.xlu1 %v1055_v59 }
 0x22d   : > { %v1056_v60 = vpop.f32.mrf.mxu1 }
 0x22e   : > { %v1057_v61 = vadd.f32 %v1599_v53, %v1056_v60 }
 0x230   : > { %1065 = vmax.xlane.f32.xlu1 %v1057_v61 }
 0x28b   : > { %v1060_v62 = vpop.xlane.xlu0 %1059 }
 0x28c   : > { %v1067_v63 = vsub.f32 %v1050_v55, %v1060_v62 }
 0x28e   : > { %v1071_v0 = vmul.f32 1.442695, %v1067_v63 }
 0x290   : > { %1600 = vpow2.f32 %v1071_v0 }
 0x293   : > { %v1062_v1 = vpop.xlane.xlu0 %1061 }
 0x294   : > { %v1068_v2 = vsub.f32 %v1052_v57, %v1062_v1 }
 0x296   : > { %v1601_v3 = vpop.eup %1600  ;;  %v1073_v4 = vmul.f32 1.442695, %v1068_v2 }
 0x297   : > { %1079 = vadd.xlane.f32.xlu2 %v1601_v3 }
 0x298   : > { %1602 = vpow2.f32 %v1073_v4 }
 0x29b   : > { %v1064_v5 = vpop.xlane.xlu1 %1063 }
 0x29c   : > { %v1069_v6 = vsub.f32 %v1055_v59, %v1064_v5 }
 0x29e   : > { %v1603_v7 = vpop.eup %1602  ;;  %v1075_v8 = vmul.f32 1.442695, %v1069_v6 }
 0x29f   : > { %1081 = vadd.xlane.f32.xlu2 %v1603_v7 }
 0x2a0   : > { %1604 = vpow2.f32 %v1075_v8 }
 0x2a3   : > { %v1066_v9 = vpop.xlane.xlu1 %1065 }
 0x2a4   : > { %v1070_v10 = vsub.f32 %v1057_v61, %v1066_v9 }
 0x2a6   : > { %v1605_v11 = vpop.eup %1604  ;;  %v1077_v12 = vmul.f32 1.442695, %v1070_v10 }
 0x2a7   : > { %1083 = vadd.xlane.f32.xlu0 %v1605_v11 }
 0x2a8   : > { %1606 = vpow2.f32 %v1077_v12 }
 0x2ae   : > { %v1607_v13 = vpop.eup %1606 }
 0x2af   : > { %1085 = vadd.xlane.f32.xlu1 %v1607_v13 }
 0x30a   : > { %v1080_v14 = vpop.xlane.xlu2 %1079 }
 0x30b   : > { %1608 = vlog2.f32 %v1080_v14 }
 0x311   : > { %v1609_v15 = vpop.eup %1608 }
 0x312   : > { %v1088_v16 = vmul.f32 0.6931472, %v1609_v15  ;;  %v1082_v17 = vpop.xlane.xlu2 %1081 }
 0x313   : > { %1610 = vlog2.f32 %v1082_v17 }
 0x314   : > { %v1095_v18 = vsub.f32 %v1067_v63, %v1088_v16 }
 0x316   : > { %1099 = vst [vmem:[%s316_s1] sm:$0xff] %v1095_v18 }
 0x319   : > { %v1611_v19 = vpop.eup %1610 }
 0x31a   : > { %v1090_v20 = vmul.f32 0.6931472, %v1611_v19  ;;  %v1084_v21 = vpop.xlane.xlu0 %1083 }
 0x31b   : > { %1612 = vlog2.f32 %v1084_v21 }
 0x31c   : > { %v1096_v22 = vsub.f32 %v1068_v2, %v1090_v20 }
 0x31e   : > { %1100 = vst [vmem:[%s316_s1 + $0x8] sm:$0xff] %v1096_v22 }
 0x321   : > { %v1613_v23 = vpop.eup %1612 }
 0x322   : > { %v1092_v24 = vmul.f32 0.6931472, %v1613_v23  ;;  %v1086_v25 = vpop.xlane.xlu1 %1085 }
 0x323   : > { %1614 = vlog2.f32 %v1086_v25 }
 0x324   : > { %v1097_v26 = vsub.f32 %v1069_v6, %v1092_v24 }
 0x326   : > { %1101 = vst [vmem:[%s316_s1 + $0x10] sm:$0xff] %v1097_v26 }
 0x329   : > { %v1615_v27 = vpop.eup %1614 }
 0x32a   : > { %v1094_v28 = vmul.f32 0.6931472, %v1615_v27 }
 0x32c   : > { %v1098_v29 = vsub.f32 %v1070_v10, %v1094_v28 }
 0x32e   : > { %1102 = vst [vmem:[%s316_s1 + $0x18] sm:$0xff] %v1098_v29 }
 0x32f   : > { %1703 = shalt.err (!%p1700_p10)
}
 0x330   : > { %s1753_s11 = smov 128   ;;  %s1754_s26 = smov 8  }
 0x331   : > { %1540 = dma.vmem_to_hbm [thread:$0]  (%p1862_p7), %s1117_s16, 512, %s1119_s17, %s1104_s18, %s1753_s11, %s1753_s11, %s1754_s26  }
 0x332 PF: > { %s1133_s20 = sand.u32 1, %s1734_s24   ;;  %p2027_p12 = scmp.ge.s32.totalorder %s1746_s27, 2 }
 0x333   : > { %s1134_s1 = scalar_lea.sflag [#allocation4], %s1133_s20 }
 0x334   : > { %p1551_p13 = pnand %p2027_p12, %p1830_p6 }
 0x336   : > { %p1552_p0 = pneg %p1551_p13 }
 0x338   : > { %1729 = dma.done.wait (%p1552_p0), %s1134_s1, 512  }
 0x339   : > { %1731 = vsyncadd (%p1552_p0), %s1134_s1, 4294966784  ;;  %s2028_s30 = sld [smem:[#allocation11_spill]]  ;;  %p21_p3 = scmp.ge.s32.totalorder %s1848_s15, 4  }
 0x33a   : > { %s2029_s26 = sld [smem:[#allocation12_spill]]  ;;  %s2030_s24 = smov %s1738_s25 }
 0x33b   : > { %s2032_s27 = smov %s1848_s15  ;;  %23 = sbr.rel (!%p21_p3) target bundleno = 8 (0x8), region = 97 }
 0x33f   : > { %s2031_s25 = smov %s2028_s30 }
 0x340   :  { %1140 = vsyncpa [#allocation3], 1 }
 0x341   :  { %1142 = vsyncpa [#allocation3 + $0x1], 1 }
 0x342   :  { %1143 = vsyncpa [#allocation6], 1 }
 0x343   :  { %1144 = vsyncpa [#allocation4], 1 }
 0x344   :  { %1146 = vsyncpa [#allocation4 + $0x1], 1 }

</bundles_post_ra>
